<compile_context>
chip_gen: v7x
topology: tpu7x:2x2x1
jax: 0.10.0
libtpu: 0.0.40
codegen_flags: <defaults>
</compile_context>

<pallas_src>
import jax
import jax.numpy as jnp
from jax.experimental import pallas as pl
from jax.experimental.pallas import tpu as pltpu

LANE = 128          # vreg lane width
SUBLANE = 8         # f32 vreg sublane count
TARGET_ROWS = 4096  # 4096 x 128 = 512K batch elems (~6 MB HBM traffic) per step
SPLIT_ROWS = 512    # min rows per step worth splitting across 2 TensorCores


def _round_up(n, m):
    return ((n + m - 1) // m) * m


def logreg_kernel(w_ref, b_ref, xt_ref, o_ref):
    # w_ref: (2,) f32 in SMEM    b_ref: (1,) f32 in SMEM
    # xt_ref: (2, TILE_R, 128) f32 in VMEM (feature-major; batch dense on both
    #         the sublane and lane axes)
    # o_ref : (TILE_R, 128) f32 in VMEM (fully dense output slab)
    w0 = w_ref[0]
    w1 = w_ref[1]
    b = b_ref[0]
    x0 = xt_ref[0]                    # (TILE_R, 128) fully dense vregs
    x1 = xt_ref[1]                    # (TILE_R, 128)
    z = x0 * w0 + x1 * w1 + b         # two scalar-broadcast FMAs on the VPU
    # jax.nn.sigmoid lowers to a numerically stable exp on the EUP; on v5e one
    # could instead use jnp.exp(-z) + pl.reciprocal(1 + e, approx=True) to
    # force the divide onto the EUP slot as well.
    o_ref[...] = jax.nn.sigmoid(z).astype(o_ref.dtype)


def logreg_forward(x, weight, bias):
    """y = sigmoid(x @ weight.T + bias).

    x: (B, 2), weight: (1, 2), bias: (1,)  ->  (B, 1) float32.
    """
    B = x.shape[0]

    # ---- Tiling: batch laid out dense over (sublane, lane) = (rows, 128). ----
    rows = pl.cdiv(B, LANE)                       # rows of 128 batch elements
    if rows >= 2 * TARGET_ROWS:
        tile_rows = TARGET_ROWS                               # many ~6 MB steps
    elif rows >= 2 * SPLIT_ROWS:
        tile_rows = _round_up(pl.cdiv(rows, 2), SUBLANE)      # 2 steps -> 2 TCs
    else:
        tile_rows = _round_up(max(rows, SUBLANE), SUBLANE)    # one small step
    num_tiles = pl.cdiv(rows, tile_rows)
    padded_rows = num_tiles * tile_rows
    padded_b = padded_rows * LANE

    # Feature-major, zero-padded slab.  Padding computes sigmoid(bias) (finite,
    # never NaN) and is sliced off after the call.  allow_input_fusion below
    # lets XLA fuse this transpose/pad into the Pallas operand rather than
    # making a separate HBM pass.
    xt = (jnp.zeros((2, padded_b), jnp.float32)
          .at[:, :B].set(x.T.astype(jnp.float32))
          .reshape(2, padded_rows, LANE))
    w_flat = weight.reshape(2).astype(jnp.float32)
    b_flat = bias.reshape(1).astype(jnp.float32)

    cost = pl.CostEstimate(
        flops=4 * padded_b,
        transcendentals=padded_b,
        bytes_accessed=12 * padded_b,             # 8 B/elem in + 4 B/elem out
    )

    out = pl.pallas_call(
        logreg_kernel,
        out_shape=jax.ShapeDtypeStruct((padded_rows, LANE), jnp.float32),
        grid_spec=pltpu.PrefetchScalarGridSpec(
            num_scalar_prefetch=0,
            grid=(num_tiles,),
            in_specs=[
                pl.BlockSpec(memory_space=pltpu.MemorySpace.SMEM),   # weight
                pl.BlockSpec(memory_space=pltpu.MemorySpace.SMEM),   # bias
                pl.BlockSpec((2, tile_rows, LANE), lambda i: (0, i, 0)),
            ],
            out_specs=pl.BlockSpec((tile_rows, LANE), lambda i: (i, 0)),
        ),
        compiler_params=pltpu.CompilerParams(
            dimension_semantics=("parallel",),
            allow_input_fusion=[False, False, True],
        ),
        cost_estimate=cost,
    )(w_flat, b_flat, xt)

    return out.reshape(padded_b)[:B].reshape(B, 1)


if __name__ == "__main__":
    key = jax.random.PRNGKey(0)
    k_x, k_w, k_b = jax.random.split(key, 3)

    B = 8  # small batch
    in_features, out_features = 2, 1

    # Inputs
    x = jax.random.normal(k_x, (B, in_features), dtype=jnp.float32)

    # Deterministic parameter init (mimics PyTorch Linear uniform(-1/sqrt(fan_in), ...))
    bound = 1.0 / jnp.sqrt(jnp.float32(in_features))
    weight = jax.random.uniform(
        k_w, (out_features, in_features), minval=-bound, maxval=bound,
        dtype=jnp.float32)
    bias = jax.random.uniform(
        k_b, (out_features,), minval=-bound, maxval=bound, dtype=jnp.float32)

    out = logreg_forward(x, weight, bias)
    out = jax.block_until_ready(out)

    # Reference check in plain JAX
    ref = jax.nn.sigmoid(x @ weight.T + bias)
    assert out.shape == (B, 1)
    assert jnp.allclose(out, ref, atol=1e-5, rtol=1e-5)

    print("KERNEL_OK")
</pallas_src>

<mosaic_0001>
module attributes {stable_mosaic.version = 11 : i64} {
  func.func @logreg_kernel(%arg0: i32, %arg1: memref<2xf32, #tpu.memory_space<smem>>, %arg2: memref<1xf32, #tpu.memory_space<smem>>, %arg3: memref<2x8x128xf32, #tpu.memory_space<vmem>>, %arg4: memref<8x128xf32, #tpu.memory_space<vmem>>) attributes {dimension_semantics = [#tpu.dimension_semantics<parallel>], iteration_bounds = array<i64: 1>, scalar_prefetch = 0 : i64, scratch_operands = 0 : i64, tpu.core_type = #tpu.core_type<tc>, window_params = [{transform_indices = @transform_0, window_bounds = array<i64: 2>}, {transform_indices = @transform_1, window_bounds = array<i64: 1>}, {transform_indices = @transform_2, window_bounds = array<i64: 2, 8, 128>}, {transform_indices = @transform_3, window_bounds = array<i64: 8, 128>}]} {
    %c0 = arith.constant 0 : index
    %0 = memref.load %arg1[%c0] : memref<2xf32, #tpu.memory_space<smem>>
    %c1 = arith.constant 1 : index
    %1 = memref.load %arg1[%c1] : memref<2xf32, #tpu.memory_space<smem>>
    %c0_0 = arith.constant 0 : index
    %2 = memref.load %arg2[%c0_0] : memref<1xf32, #tpu.memory_space<smem>>
    %c0_1 = arith.constant 0 : index
    %c0_2 = arith.constant 0 : index
    %c0_3 = arith.constant 0 : index
    %3 = vector.load %arg3[%c0_1, %c0_2, %c0_3] : memref<2x8x128xf32, #tpu.memory_space<vmem>>, vector<1x8x128xf32>
    %4 = vector.shape_cast %3 : vector<1x8x128xf32> to vector<8x128xf32>
    %c1_4 = arith.constant 1 : index
    %c0_5 = arith.constant 0 : index
    %c0_6 = arith.constant 0 : index
    %5 = vector.load %arg3[%c1_4, %c0_5, %c0_6] : memref<2x8x128xf32, #tpu.memory_space<vmem>>, vector<1x8x128xf32>
    %6 = vector.shape_cast %5 : vector<1x8x128xf32> to vector<8x128xf32>
    %7 = vector.broadcast %0 : f32 to vector<8x128xf32>
    %8 = arith.mulf %4, %7 : vector<8x128xf32>
    %9 = vector.broadcast %1 : f32 to vector<8x128xf32>
    %10 = arith.mulf %6, %9 : vector<8x128xf32>
    %11 = arith.addf %8, %10 : vector<8x128xf32>
    %12 = vector.broadcast %2 : f32 to vector<8x128xf32>
    %13 = arith.addf %11, %12 : vector<8x128xf32>
    %14 = arith.negf %13 : vector<8x128xf32>
    %15 = math.exp %14 : vector<8x128xf32>
    %cst = arith.constant 1.000000e+00 : f32
    %16 = vector.broadcast %cst : f32 to vector<8x128xf32>
    %17 = arith.addf %16, %15 : vector<8x128xf32>
    %18 = arith.divf %16, %17 : vector<8x128xf32>
    %c0_7 = arith.constant 0 : index
    %c0_8 = arith.constant 0 : index
    %19 = vector.load %arg4[%c0_7, %c0_8] : memref<8x128xf32, #tpu.memory_space<vmem>>, vector<8x128xf32>
    tpu.vector_store %arg4[%c0_7, %c0_8], %18 {strides = array<i32>} : memref<8x128xf32, #tpu.memory_space<vmem>>, vector<8x128xf32>,
    return
  }
  func.func @transform_0(%arg0: i32) -> i32 {
    %c0_i32 = arith.constant 0 : i32
    %c0_i32_0 = arith.constant 0 : i32
    return %c0_i32 : i32
  }
  func.func @transform_1(%arg0: i32) -> i32 {
    %c0_i32 = arith.constant 0 : i32
    %c0_i32_0 = arith.constant 0 : i32
    return %c0_i32 : i32
  }
  func.func @transform_2(%arg0: i32) -> (i32, i32, i32) {
    %c0_i32 = arith.constant 0 : i32
    %c0_i32_0 = arith.constant 0 : i32
    %c0_i32_1 = arith.constant 0 : i32
    return %c0_i32, %arg0, %c0_i32_0 : i32, i32, i32
  }
  func.func @transform_3(%arg0: i32) -> (i32, i32) {
    %c0_i32 = arith.constant 0 : i32
    %c0_i32_0 = arith.constant 0 : i32
    return %arg0, %c0_i32 : i32, i32
  }
}

</mosaic_0001>

<bundles_post_ra>
// kernel: tpu_custom_call.1
= control target key start
LH: loop header
LB: loop body
LE: loop exit
PB: predicated region body
PF: predicated region fallthrough
CT: control target
= control target key end

     0   :  { %9 = vsyncpa [#allocation6], 0  ;;  %s207_s0 = inlined_call_operand.vmem [shape: f32[2], index: 0, kind: input, shape index: {}]   ;;  %s208_s1 = inlined_call_operand.<no memory space> [shape: f32[1], index: 1, kind: input, shape index: {}]   ;;  %s209_s2 = inlined_call_operand.hbm [shape: f32[2,8,128], index: 2, kind: input, shape index: {}]   ;;  %s210_s3 = inlined_call_operand.hbm [shape: f32[8,128], index: 3, kind: output, shape index: {}]  }
   0x1   :  { %10 = vsyncpa [#allocation4], 0 }
   0x2   :  { %11 = vsyncpa [#allocation5], 0  ;;  %s18_s14 = sshll.u32 %s207_s0, 4  ;;  %s19_s14 = int_to_ptr.vmem [resolvable:$true] %s18_s14 }
   0x3   :  { %s90_s15 = scalar_lea.vmem %s19_s14, 16  ;;  %p95_p1 = scmp.lt.s32.totalorder %s19_s14, %s19_s14 }
   0x4   :  { %p91_p0 = scmp.ne.s32.totalorder %s19_s14, %s90_s15  ;;  %p96_p2 = scmp.lt.s32.totalorder %s90_s15, %s90_s15 }
   0x6   :  { %p97_p3 = por %p96_p2, %p95_p1 }
   0x8   :  { %p98_p4 = pnand %p97_p3, %p91_p0 }
   0xa   :  { %101 = shalt.err (!%p98_p4)
}
   0xb   :  { %s152_s16 = smov [#allocation3]   ;;  %s153_s17 = smov [#allocation7]  }
   0xc   :  { %21 = dma.vmem_to_smem %s19_s14, 16, %s152_s16, [#allocation6]  }
   0xd   :  { %s29_s18 = sshll.u32 %s153_s17, 4  ;;  %s102_s21 = scalar_lea.hbm %s209_s2, 256  ;;  %s30_s18 = int_to_ptr.vmem [resolvable:$true] %s29_s18 }
   0xe   :  { %p103_p5 = scmp.ne.s32.totalorder %s209_s2, %s102_s21  ;;  %p106_p6 = scmp.lt.u32.totalorder %s102_s21, %s209_s2 }
  0x10   :  { %p108_p7 = pnand %p106_p6, %p103_p5 }
  0x12   :  { %111 = shalt.err (!%p108_p7)
}
  0x13   :  { %s112_s25 = scalar_lea.vmem %s30_s18, 256  ;;  %p117_p9 = scmp.lt.s32.totalorder %s30_s18, %s30_s18 }
  0x14   :  { %p113_p8 = scmp.ne.s32.totalorder %s30_s18, %s112_s25  ;;  %p118_p10 = scmp.lt.s32.totalorder %s112_s25, %s112_s25 }
  0x16   :  { %p119_p11 = por %p118_p10, %p117_p9 }
  0x18   :  { %p120_p12 = pnand %p119_p11, %p113_p8 }
  0x1a   :  { %123 = shalt.err (!%p120_p12)
}
  0x1b   :  { %s154_s26 = smov 128   ;;  %s155_s27 = smov 8  }
  0x1c   :  { %35 = dma.hbm_to_vmem [thread:$0]  %s209_s2, 256, %s30_s18, [#allocation4], %s154_s26, %s154_s26, %s155_s27  }
  0x1d   :  { %146 = dma.done.wait [#allocation6], 16  }
  0x1e   :  { %147 = vsyncadd [#allocation6], 4294967280 }
  0x1f   :  { %148 = dma.done.wait [#allocation4], 256  }
  0x20   :  { %149 = vsyncadd [#allocation4], 4294967040 }
  0x21   :  { %42 = sfence }
  0x22   :  { %s43_s30 = sld [smem:[#allocation3]]  ;;  %s79_s4 = sld [smem:[#allocation3 + $0x1]]  ;;  %v46_v0 = vld [vmem:[#allocation7] sm:$0xff]  ;;  %v48_v1 = vld [vmem:[#allocation7 + $0x8] sm:$0xff]  ;;  %v54_v6 = vstv %s208_s1 }
  0x23   :  { %s156_s2 = smov [#allocation8]  }
  0x24   :  { %s69_s7 = sshll.u32 %s156_s2, 4  ;;  %s70_s7 = int_to_ptr.vmem [resolvable:$true] %s69_s7 }
  0x25   :  { %s124_s8 = scalar_lea.vmem %s70_s7, 128  ;;  %p129_p0 = scmp.lt.s32.totalorder %s70_s7, %s70_s7 }
  0x26   :  { %p125_p13 = scmp.ne.s32.totalorder %s70_s7, %s124_s8  ;;  %p130_p1 = scmp.lt.s32.totalorder %s124_s8, %s124_s8 }
  0x28   :  { %v49_v2 = vstv %s43_s30  ;;  %v51_v3 = vstv %s79_s4  ;;  %p131_p2 = por %p130_p1, %p129_p0 }
  0x29   :  { %v50_v4 = vmul.f32 %v49_v2, %v46_v0  ;;  %v52_v5 = vmul.f32 %v51_v3, %v48_v1 }
  0x2a   :  { %p132_p3 = pnand %p131_p2, %p125_p13 }
  0x2b   :  { %v53_v7 = vadd.f32 %v52_v5, %v50_v4 }
  0x2d   :  { %v55_v8 = vadd.f32 %v54_v6, %v53_v7 }
  0x2f   :  { %v80_v9 = vmul.f32 -1.442695, %v55_v8 }
  0x31   :  { %86 = vpow2.f32 %v80_v9 }
  0x3b   :  { %v87_v10 = vpop.eup %86 }
  0x3c   :  { %v59_v11 = vadd.f32 1.0, %v87_v10 }
  0x3e   :  { %88 = vrcp.f32 %v59_v11 }
  0x48   :  { %v89_v12 = vpop.eup %88 }
  0x49   :  { %62 = vst [vmem:[#allocation8] sm:$0xff] %v89_v12 }
  0x4a   :  { %135 = shalt.err (!%p132_p3)
}
  0x4b   :  { %s136_s10 = scalar_lea.hbm %s210_s3, 128 }
  0x4c   :  { %p137_p4 = scmp.ne.s32.totalorder %s210_s3, %s136_s10  ;;  %p140_p5 = scmp.lt.u32.totalorder %s136_s10, %s210_s3 }
  0x4e   :  { %p142_p6 = pnand %p140_p5, %p137_p4 }
  0x50   :  { %145 = shalt.err (!%p142_p6)
}
  0x51   :  { %72 = dma.vmem_to_hbm [thread:$0]  %s70_s7, 128, %s210_s3, [#allocation5]  }
  0x52   :  { %150 = dma.done.wait [#allocation5], 128  }
  0x53   :  { %151 = vsyncadd [#allocation5], 4294967168 }
  0x54   :  { %76 = vsyncpa [#allocation4], 1 }
  0x55   :  { %77 = vsyncpa [#allocation5], 1 }
  0x56   :  { %78 = vsyncpa [#allocation6], 1 }

</bundles_post_ra>
